<compile_context>
chip_gen: v5e
topology: v5e:2x2
jax: 0.10.0
libtpu: 0.0.40
codegen_flags: <defaults>
</compile_context>

<pallas_src>
import jax
import jax.numpy as jnp
from jax.experimental import pallas as pl
from jax.experimental.pallas import tpu as pltpu

IN_FEATURES = 10
OUT_FEATURES = 1
GROUP = 128                          # batch rows packed into one lane-dense row
EXP_LANES = GROUP * IN_FEATURES      # 1280 lanes per group row
MAX_GROUPS_PER_TILE = 2048           # 262,144 batch rows / grid step (~23 MiB VMEM)


def linear_kernel(b_sref, x_ref, w_ref, o_ref):
    # b_sref: (1,)         f32 SMEM  -- scalar-prefetched bias, grid-resident
    # x_ref : (gt, 1280)   f32 VMEM  -- 128 batch rows x 10 features per row
    # w_ref : (1280, 128)  f32 VMEM  -- block-diagonal expanded weights
    # o_ref : (gt, 128)    f32 VMEM  -- 128 outputs per group row (lane-dense)
    acc = jnp.dot(x_ref[...], w_ref[...], preferred_element_type=jnp.float32)
    o_ref[...] = acc + b_sref[0]


def simple_model_forward(x, w, b, *, rows_per_tile=MAX_GROUPS_PER_TILE * GROUP):
    """y = x @ w.T + b, equivalent to torch.nn.Linear(10, 1).forward(x).

    x: (B, IN) float32, w: (OUT, IN) float32, b: (OUT,) float32 -> (B, OUT).
    """
    B = x.shape[0]
    assert x.shape[1] == IN_FEATURES
    x = x.astype(jnp.float32)

    num_groups = pl.cdiv(B, GROUP)
    b_pad = num_groups * GROUP
    if b_pad != B:
        # Only non-128-aligned batches pay this extra HBM pass; aligned batches
        # take the zero-copy (metadata-only reshape) path below.
        x = jnp.pad(x, ((0, b_pad - B), (0, 0)))
    # Free row-major reshape: 128 consecutive batch rows -> one 1280-lane row.
    xg = x.reshape(num_groups, EXP_LANES)

    # Block-diagonal weight expansion (640 KiB, built once per call):
    # w_big[j*IN + f, j] = w[f]  =>  (xg @ w_big)[s, j] = dot(x[s*128 + j], w).
    w_flat = w.reshape(IN_FEATURES).astype(jnp.float32)
    w_big = jnp.kron(jnp.eye(GROUP, dtype=jnp.float32), w_flat[:, None])
    b_flat = b.reshape(OUT_FEATURES).astype(jnp.float32)

    # Biggest tile (in 128-row groups) that fits the VMEM budget; must be a
    # multiple of 8 sublanes unless it covers the whole array.
    gt_cap = max(8, (min(rows_per_tile // GROUP, MAX_GROUPS_PER_TILE) // 8) * 8)
    gt = num_groups if num_groups <= gt_cap else gt_cap
    grid = (pl.cdiv(num_groups, gt),)

    yg = pl.pallas_call(
        linear_kernel,
        out_shape=jax.ShapeDtypeStruct((num_groups, GROUP), jnp.float32),
        grid_spec=pltpu.PrefetchScalarGridSpec(
            num_scalar_prefetch=1,                    # bias -> SMEM, resident
            grid=grid,
            in_specs=[
                pl.BlockSpec((gt, EXP_LANES), lambda i, b_s: (i, 0)),
                pl.BlockSpec((EXP_LANES, GROUP), lambda i, b_s: (0, 0)),
            ],
            out_specs=pl.BlockSpec((gt, GROUP), lambda i, b_s: (i, 0)),
        ),
        compiler_params=pltpu.CompilerParams(
            # Pure batch parallelism: lets v7x shard grid steps over both TCs.
            dimension_semantics=("parallel",),
            # ~23 MiB double-buffered footprint at the max tile; 32 MiB is
            # above v5e's 16 MiB default and within v7x's 64 MiB/TC physical.
            vmem_limit_bytes=32 * 1024 * 1024,
        ),
    )(b_flat, xg, w_big)

    # (num_groups, 128) -> (b_pad, 1) is again a free row-major reshape.
    return yg.reshape(b_pad, OUT_FEATURES)[:B]


def init_params(key):
    # Mimic torch.nn.Linear default init: U(-1/sqrt(fan_in), 1/sqrt(fan_in)).
    kw, kb = jax.random.split(key)
    bound = 1.0 / jnp.sqrt(jnp.float32(IN_FEATURES))
    w = jax.random.uniform(kw, (OUT_FEATURES, IN_FEATURES), jnp.float32,
                           minval=-bound, maxval=bound)
    b = jax.random.uniform(kb, (OUT_FEATURES,), jnp.float32,
                           minval=-bound, maxval=bound)
    return w, b


if __name__ == "__main__":
    key = jax.random.PRNGKey(0)
    k_param, k_x = jax.random.split(key)
    w, b = init_params(k_param)

    # Elementwise f32 reference (no matmul-precision ambiguity in the check).
    def reference(x):
        return jnp.sum(x * w.reshape(1, IN_FEATURES), axis=1, keepdims=True) + b

    fwd = jax.jit(simple_model_forward, static_argnames=("rows_per_tile",))

    # Case 1: batch not a multiple of 128 with a small tile -> exercises the
    # pad path, a 2-step pipelined grid, and a ragged final block.
    x1 = jax.random.normal(k_x, (1500, IN_FEATURES), dtype=jnp.float32)
    y1 = fwd(x1, w, b, rows_per_tile=1024)
    jax.block_until_ready(y1)
    assert y1.shape == (1500, OUT_FEATURES), y1.shape
    assert jnp.allclose(y1, reference(x1), atol=1e-4, rtol=1e-4)

    # Case 2: 128-aligned batch with the default tile -> zero-copy single-block path.
    x2 = jax.random.normal(jax.random.fold_in(k_x, 1), (256, IN_FEATURES),
                           dtype=jnp.float32)
    y2 = fwd(x2, w, b)
    jax.block_until_ready(y2)
    assert y2.shape == (256, OUT_FEATURES), y2.shape
    assert jnp.allclose(y2, reference(x2), atol=1e-4, rtol=1e-4)

    print("KERNEL_OK")
</pallas_src>

<mosaic_0001>
module attributes {stable_mosaic.version = 11 : i64} {
  func.func @linear_kernel(%arg0: i32, %arg1: memref<1xf32, #tpu.memory_space<smem>>, %arg2: memref<8x1280xf32, #tpu.memory_space<vmem>>, %arg3: memref<1280x128xf32, #tpu.memory_space<vmem>>, %arg4: memref<8x128xf32, #tpu.memory_space<vmem>>) attributes {dimension_semantics = [#tpu.dimension_semantics<parallel>], iteration_bounds = array<i64: 2>, scalar_prefetch = 1 : i64, scratch_operands = 0 : i64, tpu.core_type = #tpu.core_type<tc>, window_params = [{transform_indices = @transform_0, window_bounds = array<i64: 8, 1280>}, {pipeline_mode = #tpu.pipeline_mode<synchronous>, transform_indices = @transform_1, window_bounds = array<i64: 1280, 128>}, {transform_indices = @transform_2, window_bounds = array<i64: 8, 128>}]} {
    %c0 = arith.constant 0 : index
    %c0_0 = arith.constant 0 : index
    %0 = vector.load %arg2[%c0, %c0_0] : memref<8x1280xf32, #tpu.memory_space<vmem>>, vector<8x1280xf32>
    %c0_1 = arith.constant 0 : index
    %c0_2 = arith.constant 0 : index
    %1 = vector.load %arg3[%c0_1, %c0_2] : memref<1280x128xf32, #tpu.memory_space<vmem>>, vector<1280x128xf32>
    %cst = arith.constant dense<0.000000e+00> : vector<8x128xf32>
    %2 = tpu.matmul %0, %1, %cst {dimension_numbers = #tpu.dot_dimension_numbers<[1], [0], [0], [1], [0, 0, 1, 1], [], []>} : vector<8x1280xf32>, vector<1280x128xf32>, vector<8x128xf32> -> vector<8x128xf32>
    %c0_3 = arith.constant 0 : index
    %3 = memref.load %arg1[%c0_3] : memref<1xf32, #tpu.memory_space<smem>>
    %4 = vector.broadcast %3 : f32 to vector<8x128xf32>
    %5 = arith.addf %2, %4 : vector<8x128xf32>
    %c0_4 = arith.constant 0 : index
    %c0_5 = arith.constant 0 : index
    %6 = vector.load %arg4[%c0_4, %c0_5] : memref<8x128xf32, #tpu.memory_space<vmem>>, vector<8x128xf32>
    tpu.vector_store %arg4[%c0_4, %c0_5], %5 {strides = array<i32>} : memref<8x128xf32, #tpu.memory_space<vmem>>, vector<8x128xf32>,
    return
  }
  func.func @transform_0(%arg0: i32, %arg1: memref<1xf32, #tpu.memory_space<smem>>) -> (i32, i32) {
    %c0_i32 = arith.constant 0 : i32
    %c0_i32_0 = arith.constant 0 : i32
    return %arg0, %c0_i32 : i32, i32
  }
  func.func @transform_1(%arg0: i32, %arg1: memref<1xf32, #tpu.memory_space<smem>>) -> (i32, i32) {
    %c0_i32 = arith.constant 0 : i32
    %c0_i32_0 = arith.constant 0 : i32
    %c0_i32_1 = arith.constant 0 : i32
    return %c0_i32, %c0_i32_0 : i32, i32
  }
  func.func @transform_2(%arg0: i32, %arg1: memref<1xf32, #tpu.memory_space<smem>>) -> (i32, i32) {
    %c0_i32 = arith.constant 0 : i32
    %c0_i32_0 = arith.constant 0 : i32
    return %arg0, %c0_i32 : i32, i32
  }
}

</mosaic_0001>

<bundles_post_ra>
// kernel: simple_model_forward.1
= control target key start
LH: loop header
LB: loop body
LE: loop exit
PB: predicated region body
PF: predicated region fallthrough
CT: control target
= control target key end

     0   :  { %s619_s14 = smov 0   ;;  %s1142_s0 = inlined_call_operand.<no memory space> [shape: f32[1], index: 0, kind: input, shape index: {}]   ;;  %s1143_s1 = inlined_call_operand.vmem [shape: f32[12,1280], index: 1, kind: input, shape index: {}]   ;;  %s1144_s2 = inlined_call_operand.vmem [shape: f32[1280,128], index: 2, kind: input, shape index: {}]   ;;  %s1145_s3 = inlined_call_operand.vmem [shape: f32[12,128], index: 3, kind: output, shape index: {}]  }
   0x1   :  { %8 = sst [smem:[#allocation3]] %s1142_s0 }
   0x2 LB: > { %s570_s15 = sadd.s32 4294967295, %s594_s14   ;;  %p574_p0 = scmp.ge.s32.totalorder %s594_s14, 1  ;;  %s594_s14 = sphi %s619_s14, %s14_s14  }
   0x3   : > { %p114_p1 = scmp.lt.s32.totalorder %s594_s14, 3 }
   0x5   : > { %p115_p2 = pnand %p574_p0, %p114_p1 }
   0x6   : > { %p893_p3 = scmp.lt.s32.totalorder (!%p115_p2), %s570_s15, 1  ;;  %s314_s4 = sld [smem:[#allocation3]] (!%p115_p2) }
   0x7   : > { %118 = sbr.rel (%p115_p2) target bundleno = 239 (0xef), region = 28 }
   0xc   : > { %v169_v0 = vld [vmem:[%s1144_s2 + $0x78] sm:$0xff]  ;;  %v168_v1 = vld [vmem:[%s1144_s2 + $0x70] sm:$0xff]  ;;  %v167_v4 = vld [vmem:[%s1144_s2 + $0x68] sm:$0xff]  ;;  %s1148_s15 = smov (!%p893_p3, %s570_s15), 1 }
   0xd   : > { %v185_v2 = vld [vmem:[%s1144_s2 + $0xf8] sm:$0xff]  ;;  %316 = vmatpush.msra.mxu0 %v169_v0  ;;  %v184_v3 = vld [vmem:[%s1144_s2 + $0xf0] sm:$0xff]  ;;  %v183_v5 = vld [vmem:[%s1144_s2 + $0xe8] sm:$0xff]  ;;  %s579_s17 = smul.u32 80, %s1148_s15 }
   0xe   : > { %336 = vmatpush.msra.mxu1 %v185_v2  ;;  %v201_v6 = vld [vmem:[%s1144_s2 + $0x178] sm:$0xff]  ;;  %v200_v7 = vld [vmem:[%s1144_s2 + $0x170] sm:$0xff]  ;;  %v166_v9 = vld [vmem:[%s1144_s2 + $0x60] sm:$0xff] }
   0xf   : > { %317 = vmatpush.msra.mxu0 %v168_v1  ;;  %v217_v8 = vld [vmem:[%s1144_s2 + $0x1f8] sm:$0xff]  ;;  %356 = vmatpush.msra.mxu2 %v201_v6  ;;  %v182_v10 = vld [vmem:[%s1144_s2 + $0xe0] sm:$0xff]  ;;  %v199_v11 = vld [vmem:[%s1144_s2 + $0x168] sm:$0xff]  ;;  %s979_s8 = scalar_lea.vmem %s1143_s1, %s579_s17 }
  0x10   : > { %337 = vmatpush.msra.mxu1 %v184_v3  ;;  %376 = vmatpush.msra.mxu3 %v217_v8  ;;  %v216_v12 = vld [vmem:[%s1144_s2 + $0x1f0] sm:$0xff]  ;;  %v165_v13 = vld [vmem:[%s1144_s2 + $0x58] sm:$0xff]  ;;  %v215_v15 = vld [vmem:[%s1144_s2 + $0x1e8] sm:$0xff] }
  0x11   : > { %318 = vmatpush.msra.mxu0 %v167_v4  ;;  %357 = vmatpush.msra.mxu2 %v200_v7  ;;  %v181_v14 = vld [vmem:[%s1144_s2 + $0xd8] sm:$0xff]  ;;  %v198_v16 = vld [vmem:[%s1144_s2 + $0x160] sm:$0xff]  ;;  %v164_v18 = vld [vmem:[%s1144_s2 + $0x50] sm:$0xff] }
  0x12   : > { %338 = vmatpush.msra.mxu1 %v183_v5  ;;  %377 = vmatpush.msra.mxu3 %v216_v12  ;;  %v214_v17 = vld [vmem:[%s1144_s2 + $0x1e0] sm:$0xff]  ;;  %v180_v19 = vld [vmem:[%s1144_s2 + $0xd0] sm:$0xff]  ;;  %v197_v20 = vld [vmem:[%s1144_s2 + $0x158] sm:$0xff] }
  0x13   : > { %319 = vmatpush.msra.mxu0 %v166_v9  ;;  %358 = vmatpush.msra.mxu2 %v199_v11  ;;  %v213_v21 = vld [vmem:[%s1144_s2 + $0x1d8] sm:$0xff]  ;;  %v163_v22 = vld [vmem:[%s1144_s2 + $0x48] sm:$0xff]  ;;  %v196_v24 = vld [vmem:[%s1144_s2 + $0x150] sm:$0xff] }
  0x14   : > { %339 = vmatpush.msra.mxu1 %v182_v10  ;;  %378 = vmatpush.msra.mxu3 %v215_v15  ;;  %v179_v23 = vld [vmem:[%s1144_s2 + $0xc8] sm:$0xff]  ;;  %v212_v25 = vld [vmem:[%s1144_s2 + $0x1d0] sm:$0xff]  ;;  %v162_v26 = vld [vmem:[%s1144_s2 + $0x40] sm:$0xff] }
  0x15   : > { %320 = vmatpush.msra.mxu0 %v165_v13  ;;  %359 = vmatpush.msra.mxu2 %v198_v16  ;;  %v178_v27 = vld [vmem:[%s1144_s2 + $0xc0] sm:$0xff]  ;;  %v195_v28 = vld [vmem:[%s1144_s2 + $0x148] sm:$0xff]  ;;  %v161_v30 = vld [vmem:[%s1144_s2 + $0x38] sm:$0xff] }
  0x16   : > { %340 = vmatpush.msra.mxu1 %v181_v14  ;;  %379 = vmatpush.msra.mxu3 %v214_v17  ;;  %v211_v29 = vld [vmem:[%s1144_s2 + $0x1c8] sm:$0xff]  ;;  %v177_v31 = vld [vmem:[%s1144_s2 + $0xb8] sm:$0xff]  ;;  %v194_v32 = vld [vmem:[%s1144_s2 + $0x140] sm:$0xff] }
  0x17   : > { %321 = vmatpush.msra.mxu0 %v164_v18  ;;  %360 = vmatpush.msra.mxu2 %v197_v20  ;;  %v210_v33 = vld [vmem:[%s1144_s2 + $0x1c0] sm:$0xff]  ;;  %v160_v34 = vld [vmem:[%s1144_s2 + $0x30] sm:$0xff]  ;;  %v193_v36 = vld [vmem:[%s1144_s2 + $0x138] sm:$0xff] }
  0x18   : > { %341 = vmatpush.msra.mxu1 %v180_v19  ;;  %380 = vmatpush.msra.mxu3 %v213_v21  ;;  %v176_v35 = vld [vmem:[%s1144_s2 + $0xb0] sm:$0xff]  ;;  %v209_v37 = vld [vmem:[%s1144_s2 + $0x1b8] sm:$0xff]  ;;  %v159_v38 = vld [vmem:[%s1144_s2 + $0x28] sm:$0xff] }
  0x19   : > { %322 = vmatpush.msra.mxu0 %v163_v22  ;;  %361 = vmatpush.msra.mxu2 %v196_v24  ;;  %v175_v39 = vld [vmem:[%s1144_s2 + $0xa8] sm:$0xff]  ;;  %v192_v40 = vld [vmem:[%s1144_s2 + $0x130] sm:$0xff]  ;;  %v158_v42 = vld [vmem:[%s1144_s2 + $0x20] sm:$0xff] }
  0x1a   : > { %342 = vmatpush.msra.mxu1 %v179_v23  ;;  %381 = vmatpush.msra.mxu3 %v212_v25  ;;  %v208_v41 = vld [vmem:[%s1144_s2 + $0x1b0] sm:$0xff]  ;;  %v174_v43 = vld [vmem:[%s1144_s2 + $0xa0] sm:$0xff]  ;;  %v191_v44 = vld [vmem:[%s1144_s2 + $0x128] sm:$0xff] }
  0x1b   : > { %323 = vmatpush.msra.mxu0 %v162_v26  ;;  %362 = vmatpush.msra.mxu2 %v195_v28  ;;  %v207_v45 = vld [vmem:[%s1144_s2 + $0x1a8] sm:$0xff]  ;;  %v157_v46 = vld [vmem:[%s1144_s2 + $0x18] sm:$0xff]  ;;  %v190_v48 = vld [vmem:[%s1144_s2 + $0x120] sm:$0xff] }
  0x1c   : > { %343 = vmatpush.msra.mxu1 %v178_v27  ;;  %382 = vmatpush.msra.mxu3 %v211_v29  ;;  %v173_v47 = vld [vmem:[%s1144_s2 + $0x98] sm:$0xff]  ;;  %v206_v49 = vld [vmem:[%s1144_s2 + $0x1a0] sm:$0xff]  ;;  %v156_v50 = vld [vmem:[%s1144_s2 + $0x10] sm:$0xff] }
  0x1d   : > { %324 = vmatpush.msra.mxu0 %v161_v30  ;;  %363 = vmatpush.msra.mxu2 %v194_v32  ;;  %v172_v51 = vld [vmem:[%s1144_s2 + $0x90] sm:$0xff]  ;;  %v189_v52 = vld [vmem:[%s1144_s2 + $0x118] sm:$0xff]  ;;  %v155_v54 = vld [vmem:[%s1144_s2 + $0x8] sm:$0xff] }
  0x1e   : > { %344 = vmatpush.msra.mxu1 %v177_v31  ;;  %383 = vmatpush.msra.mxu3 %v210_v33  ;;  %v205_v53 = vld [vmem:[%s1144_s2 + $0x198] sm:$0xff]  ;;  %v171_v55 = vld [vmem:[%s1144_s2 + $0x88] sm:$0xff]  ;;  %v188_v56 = vld [vmem:[%s1144_s2 + $0x110] sm:$0xff] }
  0x1f   : > { %325 = vmatpush.msra.mxu0 %v160_v34  ;;  %364 = vmatpush.msra.mxu2 %v193_v36  ;;  %v204_v57 = vld [vmem:[%s1144_s2 + $0x190] sm:$0xff]  ;;  %v154_v58 = vld [vmem:[%s1144_s2] sm:$0xff]  ;;  %v233_v60 = vld [vmem:[%s1144_s2 + $0x278] sm:$0xff] }
  0x20   : > { %345 = vmatpush.msra.mxu1 %v176_v35  ;;  %384 = vmatpush.msra.mxu3 %v209_v37  ;;  %v170_v59 = vld [vmem:[%s1144_s2 + $0x80] sm:$0xff]  ;;  %v249_v61 = vld [vmem:[%s1144_s2 + $0x2f8] sm:$0xff]  ;;  %v187_v62 = vld [vmem:[%s1144_s2 + $0x108] sm:$0xff] }
  0x21   : > { %326 = vmatpush.msra.mxu0 %v159_v38  ;;  %365 = vmatpush.msra.mxu2 %v192_v40  ;;  %v203_v63 = vld [vmem:[%s1144_s2 + $0x188] sm:$0xff]  ;;  %v232_v0 = vld [vmem:[%s1144_s2 + $0x270] sm:$0xff]  ;;  %v186_v2 = vld [vmem:[%s1144_s2 + $0x100] sm:$0xff] }
  0x22   : > { %346 = vmatpush.msra.mxu1 %v175_v39  ;;  %385 = vmatpush.msra.mxu3 %v208_v41  ;;  %v248_v1 = vld [vmem:[%s1144_s2 + $0x2f0] sm:$0xff]  ;;  %v202_v3 = vld [vmem:[%s1144_s2 + $0x180] sm:$0xff]  ;;  %v231_v4 = vld [vmem:[%s1144_s2 + $0x268] sm:$0xff] }
  0x23   : > { %327 = vmatpush.msra.mxu0 %v158_v42  ;;  %366 = vmatpush.msra.mxu2 %v191_v44  ;;  %v247_v5 = vld [vmem:[%s1144_s2 + $0x2e8] sm:$0xff]  ;;  %v265_v6 = vld [vmem:[%s1144_s2 + $0x378] sm:$0xff]  ;;  %v230_v8 = vld [vmem:[%s1144_s2 + $0x260] sm:$0xff] }
  0x24   : > { %347 = vmatpush.msra.mxu1 %v174_v43  ;;  %386 = vmatpush.msra.mxu3 %v207_v45  ;;  %v281_v7 = vld [vmem:[%s1144_s2 + $0x3f8] sm:$0xff]  ;;  %v246_v9 = vld [vmem:[%s1144_s2 + $0x2e0] sm:$0xff]  ;;  %v264_v10 = vld [vmem:[%s1144_s2 + $0x370] sm:$0xff] }
  0x25   : > { %328 = vmatpush.msra.mxu0 %v157_v46  ;;  %367 = vmatpush.msra.mxu2 %v190_v48  ;;  %v280_v11 = vld [vmem:[%s1144_s2 + $0x3f0] sm:$0xff]  ;;  %v229_v12 = vld [vmem:[%s1144_s2 + $0x258] sm:$0xff]  ;;  %v263_v14 = vld [vmem:[%s1144_s2 + $0x368] sm:$0xff] }
  0x26   : > { %348 = vmatpush.msra.mxu1 %v173_v47  ;;  %387 = vmatpush.msra.mxu3 %v206_v49  ;;  %v245_v13 = vld [vmem:[%s1144_s2 + $0x2d8] sm:$0xff]  ;;  %v279_v15 = vld [vmem:[%s1144_s2 + $0x3e8] sm:$0xff]  ;;  %v228_v16 = vld [vmem:[%s1144_s2 + $0x250] sm:$0xff] }
  0x27   : > { %329 = vmatpush.msra.mxu0 %v156_v50  ;;  %368 = vmatpush.msra.mxu2 %v189_v52  ;;  %v244_v17 = vld [vmem:[%s1144_s2 + $0x2d0] sm:$0xff]  ;;  %v262_v18 = vld [vmem:[%s1144_s2 + $0x360] sm:$0xff]  ;;  %v227_v20 = vld [vmem:[%s1144_s2 + $0x248] sm:$0xff] }
  0x28   : > { %349 = vmatpush.msra.mxu1 %v172_v51  ;;  %388 = vmatpush.msra.mxu3 %v205_v53  ;;  %v278_v19 = vld [vmem:[%s1144_s2 + $0x3e0] sm:$0xff]  ;;  %v243_v21 = vld [vmem:[%s1144_s2 + $0x2c8] sm:$0xff]  ;;  %v261_v22 = vld [vmem:[%s1144_s2 + $0x358] sm:$0xff] }
  0x29   : > { %330 = vmatpush.msra.mxu0 %v155_v54  ;;  %369 = vmatpush.msra.mxu2 %v188_v56  ;;  %v277_v23 = vld [vmem:[%s1144_s2 + $0x3d8] sm:$0xff]  ;;  %v226_v24 = vld [vmem:[%s1144_s2 + $0x240] sm:$0xff]  ;;  %v260_v26 = vld [vmem:[%s1144_s2 + $0x350] sm:$0xff] }
  0x2a   : > { %350 = vmatpush.msra.mxu1 %v171_v55  ;;  %389 = vmatpush.msra.mxu3 %v204_v57  ;;  %v242_v25 = vld [vmem:[%s1144_s2 + $0x2c0] sm:$0xff]  ;;  %v276_v27 = vld [vmem:[%s1144_s2 + $0x3d0] sm:$0xff]  ;;  %v225_v28 = vld [vmem:[%s1144_s2 + $0x238] sm:$0xff] }
  0x2b   : > { %331 = vmatpush.msra.mxu0 %v154_v58  ;;  %370 = vmatpush.msra.mxu2 %v187_v62  ;;  %v241_v29 = vld [vmem:[%s1144_s2 + $0x2b8] sm:$0xff]  ;;  %v259_v30 = vld [vmem:[%s1144_s2 + $0x348] sm:$0xff]  ;;  %v224_v32 = vld [vmem:[%s1144_s2 + $0x230] sm:$0xff] }
  0x2c   : > { %351 = vmatpush.msra.mxu1 %v170_v59  ;;  %390 = vmatpush.msra.mxu3 %v203_v63  ;;  %v275_v31 = vld [vmem:[%s1144_s2 + $0x3c8] sm:$0xff]  ;;  %v240_v33 = vld [vmem:[%s1144_s2 + $0x2b0] sm:$0xff]  ;;  %v258_v34 = vld [vmem:[%s1144_s2 + $0x340] sm:$0xff] }
  0x2d   : > { %396 = vmatpush.msrb.mxu0 %v233_v60  ;;  %371 = vmatpush.msra.mxu2 %v186_v2  ;;  %v274_v35 = vld [vmem:[%s1144_s2 + $0x3c0] sm:$0xff]  ;;  %v223_v36 = vld [vmem:[%s1144_s2 + $0x228] sm:$0xff]  ;;  %v257_v38 = vld [vmem:[%s1144_s2 + $0x338] sm:$0xff] }
  0x2e   : > { %416 = vmatpush.msrb.mxu1 %v249_v61  ;;  %391 = vmatpush.msra.mxu3 %v202_v3  ;;  %v239_v37 = vld [vmem:[%s1144_s2 + $0x2a8] sm:$0xff]  ;;  %v273_v39 = vld [vmem:[%s1144_s2 + $0x3b8] sm:$0xff]  ;;  %v222_v40 = vld [vmem:[%s1144_s2 + $0x220] sm:$0xff] }
  0x2f   : > { %397 = vmatpush.msrb.mxu0 %v232_v0  ;;  %436 = vmatpush.msrb.mxu2 %v265_v6  ;;  %v238_v41 = vld [vmem:[%s1144_s2 + $0x2a0] sm:$0xff]  ;;  %v256_v42 = vld [vmem:[%s1144_s2 + $0x330] sm:$0xff]  ;;  %v221_v44 = vld [vmem:[%s1144_s2 + $0x218] sm:$0xff] }
  0x30   : > { %417 = vmatpush.msrb.mxu1 %v248_v1  ;;  %456 = vmatpush.msrb.mxu3 %v281_v7  ;;  %v272_v43 = vld [vmem:[%s1144_s2 + $0x3b0] sm:$0xff]  ;;  %v237_v45 = vld [vmem:[%s1144_s2 + $0x298] sm:$0xff]  ;;  %v255_v46 = vld [vmem:[%s1144_s2 + $0x328] sm:$0xff] }
  0x31   : > { %398 = vmatpush.msrb.mxu0 %v231_v4  ;;  %437 = vmatpush.msrb.mxu2 %v264_v10  ;;  %v271_v47 = vld [vmem:[%s1144_s2 + $0x3a8] sm:$0xff]  ;;  %v220_v48 = vld [vmem:[%s1144_s2 + $0x210] sm:$0xff]  ;;  %v254_v50 = vld [vmem:[%s1144_s2 + $0x320] sm:$0xff] }
  0x32   : > { %418 = vmatpush.msrb.mxu1 %v247_v5  ;;  %457 = vmatpush.msrb.mxu3 %v280_v11  ;;  %v236_v49 = vld [vmem:[%s1144_s2 + $0x290] sm:$0xff]  ;;  %v270_v51 = vld [vmem:[%s1144_s2 + $0x3a0] sm:$0xff]  ;;  %v219_v52 = vld [vmem:[%s1144_s2 + $0x208] sm:$0xff] }
  0x33   : > { %399 = vmatpush.msrb.mxu0 %v230_v8  ;;  %438 = vmatpush.msrb.mxu2 %v263_v14  ;;  %v146_v53 = vld [vmem:[%s979_s8 + $0x10] sm:$0xff]  ;;  %v235_v54 = vld [vmem:[%s1144_s2 + $0x288] sm:$0xff]  ;;  %v253_v55 = vld [vmem:[%s1144_s2 + $0x318] sm:$0xff] }
  0x34   : > { %419 = vmatpush.msrb.mxu1 %v246_v9  ;;  %458 = vmatpush.msrb.mxu3 %v279_v15  ;;  %v218_v56 = vld [vmem:[%s1144_s2 + $0x200] sm:$0xff]  ;;  %v147_v57 = vld [vmem:[%s979_s8 + $0x18] sm:$0xff]  ;;  %v252_v61 = vld [vmem:[%s1144_s2 + $0x310] sm:$0xff] }
  0x35   : > { %400 = vmatpush.msrb.mxu0 %v229_v12  ;;  %439 = vmatpush.msrb.mxu2 %v262_v18  ;;  %v144_v58 = vld [vmem:[%s979_s8] sm:$0xff]  ;;  %v297_v60 = vld [vmem:[%s1144_s2 + $0x478] sm:$0xff]  ;;  %v145_v63 = vld [vmem:[%s979_s8 + $0x8] sm:$0xff] }
  0x36   : > { %420 = vmatpush.msrb.mxu1 %v245_v13  ;;  %459 = vmatpush.msrb.mxu3 %v278_v19  ;;  %v234_v59 = vld [vmem:[%s1144_s2 + $0x280] sm:$0xff]  ;;  %v269_v62 = vld [vmem:[%s1144_s2 + $0x398] sm:$0xff]  ;;  %v296_v0 = vld [vmem:[%s1144_s2 + $0x470] sm:$0xff] }
  0x37   : > { %401 = vmatpush.msrb.mxu0 %v228_v16  ;;  %440 = vmatpush.msrb.mxu2 %v261_v22  ;;  %v313_v1 = vld [vmem:[%s1144_s2 + $0x4f8] sm:$0xff]  ;;  %v251_v2 = vld [vmem:[%s1144_s2 + $0x308] sm:$0xff]  ;;  %v268_v3 = vld [vmem:[%s1144_s2 + $0x390] sm:$0xff] }
  0x38   : > { %421 = vmatpush.msrb.mxu1 %v244_v17  ;;  %460 = vmatpush.msrb.mxu3 %v277_v23  ;;  %v295_v4 = vld [vmem:[%s1144_s2 + $0x468] sm:$0xff]  ;;  %v312_v5 = vld [vmem:[%s1144_s2 + $0x4f0] sm:$0xff]  ;;  %v250_v6 = vld [vmem:[%s1144_s2 + $0x300] sm:$0xff] }
  0x39   : > { %402 = vmatpush.msrb.mxu0 %v227_v20  ;;  %441 = vmatpush.msrb.mxu2 %v260_v26  ;;  %v267_v7 = vld [vmem:[%s1144_s2 + $0x388] sm:$0xff]  ;;  %v150_v8 = vld [vmem:[%s979_s8 + $0x30] sm:$0xff]  ;;  %v294_v9 = vld [vmem:[%s1144_s2 + $0x460] sm:$0xff] }
  0x3a   : > { %422 = vmatpush.msrb.mxu1 %v243_v21  ;;  %461 = vmatpush.msrb.mxu3 %v276_v27  ;;  %v311_v10 = vld [vmem:[%s1144_s2 + $0x4e8] sm:$0xff]  ;;  %v266_v11 = vld [vmem:[%s1144_s2 + $0x380] sm:$0xff]  ;;  %v151_v13 = vld [vmem:[%s979_s8 + $0x38] sm:$0xff] }
  0x3b   : > { %403 = vmatpush.msrb.mxu0 %v226_v24  ;;  %442 = vmatpush.msrb.mxu2 %v259_v30  ;;  %v148_v12 = vld [vmem:[%s979_s8 + $0x20] sm:$0xff]  ;;  %v293_v14 = vld [vmem:[%s1144_s2 + $0x458] sm:$0xff]  ;;  %v149_v16 = vld [vmem:[%s979_s8 + $0x28] sm:$0xff] }
  0x3c   : > { %423 = vmatpush.msrb.mxu1 %v242_v25  ;;  %462 = vmatpush.msrb.mxu3 %v275_v31  ;;  %v310_v15 = vld [vmem:[%s1144_s2 + $0x4e0] sm:$0xff]  ;;  %v292_v17 = vld [vmem:[%s1144_s2 + $0x450] sm:$0xff]  ;;  %v309_v18 = vld [vmem:[%s1144_s2 + $0x4d8] sm:$0xff] }
  0x3d   : > { %404 = vmatpush.msrb.mxu0 %v225_v28  ;;  %443 = vmatpush.msrb.mxu2 %v258_v34  ;;  %v291_v19 = vld [vmem:[%s1144_s2 + $0x448] sm:$0xff]  ;;  %v308_v20 = vld [vmem:[%s1144_s2 + $0x4d0] sm:$0xff]  ;;  %v290_v21 = vld [vmem:[%s1144_s2 + $0x440] sm:$0xff] }
  0x3e   : > { %424 = vmatpush.msrb.mxu1 %v241_v29  ;;  %463 = vmatpush.msrb.mxu3 %v274_v35  ;;  %v307_v22 = vld [vmem:[%s1144_s2 + $0x4c8] sm:$0xff]  ;;  %v289_v23 = vld [vmem:[%s1144_s2 + $0x438] sm:$0xff]  ;;  %v306_v24 = vld [vmem:[%s1144_s2 + $0x4c0] sm:$0xff] }
  0x3f   : > { %405 = vmatpush.msrb.mxu0 %v224_v32  ;;  %444 = vmatpush.msrb.mxu2 %v257_v38  ;;  %v288_v25 = vld [vmem:[%s1144_s2 + $0x430] sm:$0xff]  ;;  %v305_v26 = vld [vmem:[%s1144_s2 + $0x4b8] sm:$0xff]  ;;  %v287_v27 = vld [vmem:[%s1144_s2 + $0x428] sm:$0xff] }
  0x40   : > { %425 = vmatpush.msrb.mxu1 %v240_v33  ;;  %464 = vmatpush.msrb.mxu3 %v273_v39  ;;  %v304_v28 = vld [vmem:[%s1144_s2 + $0x4b0] sm:$0xff]  ;;  %v286_v29 = vld [vmem:[%s1144_s2 + $0x420] sm:$0xff]  ;;  %v303_v30 = vld [vmem:[%s1144_s2 + $0x4a8] sm:$0xff] }
  0x41   : > { %406 = vmatpush.msrb.mxu0 %v223_v36  ;;  %445 = vmatpush.msrb.mxu2 %v256_v42  ;;  %v285_v31 = vld [vmem:[%s1144_s2 + $0x418] sm:$0xff]  ;;  %v302_v32 = vld [vmem:[%s1144_s2 + $0x4a0] sm:$0xff]  ;;  %v284_v33 = vld [vmem:[%s1144_s2 + $0x410] sm:$0xff]  ;;  %v315_v42 = vstv %s314_s4 }
  0x42   : > { %426 = vmatpush.msrb.mxu1 %v239_v37  ;;  %465 = vmatpush.msrb.mxu3 %v272_v43  ;;  %v301_v34 = vld [vmem:[%s1144_s2 + $0x498] sm:$0xff]  ;;  %v283_v35 = vld [vmem:[%s1144_s2 + $0x408] sm:$0xff]  ;;  %v300_v36 = vld [vmem:[%s1144_s2 + $0x490] sm:$0xff] }
  0x43   : > { %407 = vmatpush.msrb.mxu0 %v222_v40  ;;  %446 = vmatpush.msrb.mxu2 %v255_v46  ;;  %v282_v37 = vld [vmem:[%s1144_s2 + $0x400] sm:$0xff]  ;;  %v299_v38 = vld [vmem:[%s1144_s2 + $0x488] sm:$0xff] }
  0x44   : > { %427 = vmatpush.msrb.mxu1 %v238_v41  ;;  %466 = vmatpush.msrb.mxu3 %v271_v47  ;;  %v152_v39 = vld [vmem:[%s979_s8 + $0x40] sm:$0xff]  ;;  %v153_v41 = vld [vmem:[%s979_s8 + $0x48] sm:$0xff]  ;;  %s576_s8 = sshll.u32 %s1148_s15, 3 }
  0x45   : > { %408 = vmatpush.msrb.mxu0 %v221_v44  ;;  %447 = vmatpush.msrb.mxu2 %v254_v50  ;;  %v298_v40 = vld [vmem:[%s1144_s2 + $0x480] sm:$0xff]  ;;  %s143_s7 = scalar_lea.vmem %s1145_s3, %s576_s8 }
  0x46   : > { %428 = vmatpush.msrb.mxu1 %v237_v45  ;;  %467 = vmatpush.msrb.mxu3 %v270_v51 }
  0x47   : > { %409 = vmatpush.msrb.mxu0 %v220_v48  ;;  %372 = vmatmul.f32.vlgmr.msra.gmra.mxu2 %v146_v53 }
  0x48   : > { %429 = vmatpush.msrb.mxu1 %v236_v49  ;;  %448 = vmatpush.msrb.mxu2 %v253_v55 }
  0x49   : > { %410 = vmatpush.msrb.mxu0 %v219_v52  ;;  %392 = vmatmul.f32.vlgmr.msra.gmra.mxu3 %v147_v57 }
  0x4a   : > { %430 = vmatpush.msrb.mxu1 %v235_v54  ;;  %332 = vmatmul.f32.vlgmr.msra.gmra.mxu0 %v144_v58 }
  0x4b   : > { %411 = vmatpush.msrb.mxu0 %v218_v56  ;;  %449 = vmatpush.msrb.mxu2 %v252_v61 }
  0x4c   : > { %431 = vmatpush.msrb.mxu1 %v234_v59  ;;  %468 = vmatpush.msrb.mxu3 %v269_v62 }
  0x4d   : > { %476 = vmatpush.msra.mxu0 %v297_v60  ;;  %352 = vmatmul.f32.vlgmr.msra.gmra.mxu1 %v145_v63 }
  0x4e   : > { %496 = vmatpush.msra.mxu1 %v313_v1  ;;  %450 = vmatpush.msrb.mxu2 %v251_v2 }
  0x4f   : > { %477 = vmatpush.msra.mxu0 %v296_v0  ;;  %469 = vmatpush.msrb.mxu3 %v268_v3 }
  0x50   : > { %497 = vmatpush.msra.mxu1 %v312_v5  ;;  %451 = vmatpush.msrb.mxu2 %v250_v6 }
  0x51   : > { %478 = vmatpush.msra.mxu0 %v295_v4  ;;  %470 = vmatpush.msrb.mxu3 %v267_v7 }
  0x52   : > { %452 = vmatmul.f32.vlgmr.msrb.gmra.mxu2 %v150_v8  ;;  %498 = vmatpush.msra.mxu1 %v311_v10 }
  0x53   : > { %479 = vmatpush.msra.mxu0 %v294_v9  ;;  %471 = vmatpush.msrb.mxu3 %v266_v11 }
  0x54   : > { %412 = vmatmul.f32.vlgmr.msrb.gmra.mxu0 %v148_v12  ;;  %472 = vmatmul.f32.vlgmr.msrb.gmra.mxu3 %v151_v13 }
  0x55   : > { %480 = vmatpush.msra.mxu0 %v293_v14  ;;  %499 = vmatpush.msra.mxu1 %v310_v15 }
  0x56   : > { %432 = vmatmul.f32.vlgmr.msrb.gmra.mxu1 %v149_v16 }
  0x57   : > { %481 = vmatpush.msra.mxu0 %v292_v17  ;;  %500 = vmatpush.msra.mxu1 %v309_v18 }
  0x59   : > { %482 = vmatpush.msra.mxu0 %v291_v19  ;;  %501 = vmatpush.msra.mxu1 %v308_v20 }
  0x5b   : > { %483 = vmatpush.msra.mxu0 %v290_v21  ;;  %502 = vmatpush.msra.mxu1 %v307_v22 }
  0x5d   : > { %484 = vmatpush.msra.mxu0 %v289_v23  ;;  %503 = vmatpush.msra.mxu1 %v306_v24 }
  0x5f   : > { %485 = vmatpush.msra.mxu0 %v288_v25  ;;  %504 = vmatpush.msra.mxu1 %v305_v26 }
  0x61   : > { %486 = vmatpush.msra.mxu0 %v287_v27  ;;  %505 = vmatpush.msra.mxu1 %v304_v28 }
  0x63   : > { %487 = vmatpush.msra.mxu0 %v286_v29  ;;  %506 = vmatpush.msra.mxu1 %v303_v30 }
  0x65   : > { %488 = vmatpush.msra.mxu0 %v285_v31  ;;  %507 = vmatpush.msra.mxu1 %v302_v32 }
  0x67   : > { %489 = vmatpush.msra.mxu0 %v284_v33  ;;  %508 = vmatpush.msra.mxu1 %v301_v34 }
  0x69   : > { %490 = vmatpush.msra.mxu0 %v283_v35  ;;  %509 = vmatpush.msra.mxu1 %v300_v36 }
  0x6b   : > { %491 = vmatpush.msra.mxu0 %v282_v37  ;;  %510 = vmatpush.msra.mxu1 %v299_v38 }
  0x6c   : > { %492 = vmatmul.f32.vlgmr.msra.gmra.mxu0 %v152_v39 }
  0x6d   : > { %511 = vmatpush.msra.mxu1 %v298_v40 }
  0x6e   : > { %512 = vmatmul.f32.vlgmr.msra.gmra.mxu1 %v153_v41 }
  0xc7   : > { %v333_v43 = vpop.f32.mrf.mxu0 }
  0xc8   : > { %v334_v44 = vadd.f32 %v333_v43, %v315_v42 }
  0xca   : > { %v353_v45 = vpop.f32.mrf.mxu1  ;;  %v373_v47 = vpop.f32.mrf.mxu2 }
  0xcb   : > { %v354_v46 = vadd.f32 %v353_v45, %v334_v44 }
  0xcc   : > { %v393_v49 = vpop.f32.mrf.mxu3 }
  0xcd   : > { %v374_v48 = vadd.f32 %v373_v47, %v354_v46 }
  0xcf   : > { %v394_v50 = vadd.f32 %v393_v49, %v374_v48 }
  0xd1   : > { %v413_v51 = vpop.f32.mrf.mxu0 }
  0xd2   : > { %v414_v52 = vadd.f32 %v413_v51, %v394_v50 }
  0xd3   : > { %v433_v53 = vpop.f32.mrf.mxu1 }
  0xd4   : > { %v434_v54 = vadd.f32 %v433_v53, %v414_v52 }
  0xd5   : > { %v453_v55 = vpop.f32.mrf.mxu2 }
  0xd6   : > { %v454_v56 = vadd.f32 %v453_v55, %v434_v54 }
  0xd7   : > { %v473_v57 = vpop.f32.mrf.mxu3 }
  0xd8   : > { %v474_v58 = vadd.f32 %v473_v57, %v454_v56 }
  0xe9   : > { %v493_v59 = vpop.f32.mrf.mxu0 }
  0xea   : > { %v494_v60 = vadd.f32 %v493_v59, %v474_v58 }
  0xeb   : > { %v513_v61 = vpop.f32.mrf.mxu1 }
  0xec   : > { %v514_v62 = vadd.f32 %v513_v61, %v494_v60 }
  0xee   : > { %516 = vst [vmem:[%s143_s7] sm:$0xff] %v514_v62 }
  0xef PF: > { %s14_s14 = sadd.s32 1, %s594_s14  }
  0xf0   : > { %p11_p4 = scmp.ge.s32.totalorder %s14_s14, 4  }
  0xf2   :  { %13 = sbr.rel (!%p11_p4) target bundleno = 2 (0x2), region = 58 }

</bundles_post_ra>
